<compile_context>
chip_gen: v7x
topology: tpu7x:2x2x1
jax: 0.10.0
libtpu: 0.0.40
codegen_flags: <defaults>
</compile_context>

<pallas_src>
import jax
import jax.numpy as jnp
from jax.experimental import pallas as pl
from jax.experimental.pallas import tpu as pltpu


# ----------------------------- fused kernel ---------------------------------


def vae_fused_kernel(x_ref, eps_ref,
                     ew1_ref, eb1_ref, ewmv_ref, ebmv_ref,
                     dw1_ref, db1_ref, dw2_ref, db2_ref,
                     zmean_ref, zlogvar_ref, recon_ref):
    """Fused encoder -> reparameterize -> decoder for one batch tile.

    encoder:  h = relu(x @ W1 + b1);  [mean | logvar] = h @ Wmv + bmv
    reparam:  z = eps * exp(0.5 * logvar) + mean
    decoder:  hd = relu(z @ V1 + c1); recon = sigmoid(hd @ V2 + c2)

    All matmuls take bf16 operands and accumulate in f32 on the MXU;
    elementwise math (bias, relu, exp, sigmoid) runs in f32.
    """
    L = zmean_ref.shape[1]

    # ---------------- encoder ----------------
    h = jnp.dot(x_ref[...], ew1_ref[...], preferred_element_type=jnp.float32)
    h = jnp.maximum(h + eb1_ref[...], 0.0)

    # single (Hd, 2L) projection: one MXU pass for mean AND logvar
    s = jnp.dot(h.astype(ewmv_ref.dtype), ewmv_ref[...],
                preferred_element_type=jnp.float32) + ebmv_ref[...]
    z_mean = s[:, :L]
    z_log_var = s[:, L:]
    zmean_ref[...] = z_mean
    zlogvar_ref[...] = z_log_var

    # ---------------- reparameterize (z = eps * exp(0.5*logvar) + mean) -----
    z = eps_ref[...] * jnp.exp(0.5 * z_log_var) + z_mean

    # ---------------- decoder ----------------
    hd = jnp.dot(z.astype(dw1_ref.dtype), dw1_ref[...],
                 preferred_element_type=jnp.float32)
    hd = jnp.maximum(hd + db1_ref[...], 0.0)
    logits = jnp.dot(hd.astype(dw2_ref.dtype), dw2_ref[...],
                     preferred_element_type=jnp.float32) + db2_ref[...]
    recon_ref[...] = jax.nn.sigmoid(logits)


# ----------------------------- wrapper ---------------------------------------


def _round_up(x, m):
    return (x + m - 1) // m * m


def vae_forward(x_nchw, params, eps_key, kl_weight=1.0, block_b=128):
    """Mirrors VariationalAutoEncoderModelV0.forward:
    returns (z_mean, z_log_var, reconstruction)."""
    del kl_weight  # unused in the forward pass of the module

    B, C, H, W = x_nchw.shape
    D = C * H * W
    Hd = params["enc_w1"].shape[1]
    L = params["enc_wmv"].shape[1] // 2

    # eps = randn_like(std): generated in JAX glue, consumed inside the fused
    # kernel (single launch, no inter-kernel HBM round trip).
    # TODO(synk): could move eps generation in-kernel via pltpu.prng_* to drop
    # this small HBM array entirely.
    eps = jax.random.normal(eps_key, (B, L), jnp.float32)

    # Batch tiling: BM rows per grid step, padded to >=8 sublanes.
    BM = block_b if B > block_b else _round_up(B, 8)
    B_pad = _round_up(B, BM)

    x2d = x_nchw.reshape(B, D).astype(jnp.bfloat16)
    if B_pad != B:
        x2d = jnp.pad(x2d, ((0, B_pad - B), (0, 0)))
        eps_p = jnp.pad(eps, ((0, B_pad - B), (0, 0)))
    else:
        eps_p = eps

    def row_spec(n):   # batch-tiled arrays
        return pl.BlockSpec((BM, n), lambda i: (i, 0))

    def rep_spec(shp):  # weights/biases, resident across all grid steps
        return pl.BlockSpec(shp, lambda i: (0, 0))

    z_mean_p, z_log_var_p, recon_p = pl.pallas_call(
        vae_fused_kernel,
        out_shape=(
            jax.ShapeDtypeStruct((B_pad, L), jnp.float32),
            jax.ShapeDtypeStruct((B_pad, L), jnp.float32),
            jax.ShapeDtypeStruct((B_pad, D), jnp.float32),
        ),
        grid=(B_pad // BM,),
        in_specs=[
            row_spec(D),                # x
            row_spec(L),                # eps
            rep_spec((D, Hd)),          # encoder W1   (bf16)
            rep_spec((1, Hd)),          # encoder b1   (f32)
            rep_spec((Hd, 2 * L)),      # encoder Wmv  (bf16, mean|logvar fused)
            rep_spec((1, 2 * L)),       # encoder bmv  (f32)
            rep_spec((L, Hd)),          # decoder W1   (bf16)
            rep_spec((1, Hd)),          # decoder b1   (f32)
            rep_spec((Hd, D)),          # decoder W2   (bf16)
            rep_spec((1, D)),           # decoder b2   (f32)
        ],
        out_specs=(row_spec(L), row_spec(L), row_spec(D)),
        compiler_params=pltpu.CompilerParams(
            dimension_semantics=("parallel",)),
    )(x2d, eps_p,
      params["enc_w1"], params["enc_b1"],
      params["enc_wmv"], params["enc_bmv"],
      params["dec_w1"], params["dec_b1"],
      params["dec_w2"], params["dec_b2"])

    z_mean = z_mean_p[:B]
    z_log_var = z_log_var_p[:B]
    reconstruction = recon_p[:B].reshape(B, C, H, W)
    return z_mean, z_log_var, reconstruction


def init_params(key, d_in, hidden, latent):
    ks = jax.random.split(key, 5)
    s = lambda fan_in: 1.0 / jnp.sqrt(jnp.float32(fan_in))
    wdt = jnp.bfloat16  # MXU-native operand dtype; accumulation stays f32

    enc_wm = jax.random.normal(ks[1], (hidden, latent), jnp.float32) * s(hidden)
    enc_wv = jax.random.normal(ks[2], (hidden, latent), jnp.float32) * s(hidden)

    return dict(
        # encoder
        enc_w1=(jax.random.normal(ks[0], (d_in, hidden), jnp.float32)
                * s(d_in)).astype(wdt),
        enc_b1=jnp.zeros((1, hidden), jnp.float32),
        # fused mean/logvar projection: one (Hd, 2L) weight -> one matmul
        enc_wmv=jnp.concatenate([enc_wm, enc_wv], axis=1).astype(wdt),
        enc_bmv=jnp.zeros((1, 2 * latent), jnp.float32),
        # decoder
        dec_w1=(jax.random.normal(ks[3], (latent, hidden), jnp.float32)
                * s(latent)).astype(wdt),
        dec_b1=jnp.zeros((1, hidden), jnp.float32),
        dec_w2=(jax.random.normal(ks[4], (hidden, d_in), jnp.float32)
                * s(hidden)).astype(wdt),
        dec_b2=jnp.zeros((1, d_in), jnp.float32),
    )


if __name__ == "__main__":
    key = jax.random.PRNGKey(0)
    k_x, k_p, k_eps = jax.random.split(key, 3)

    B, C, H, W = 2, 4, 16, 16
    HIDDEN, LATENT = 32, 8

    x = jax.random.normal(k_x, (B, C, H, W), jnp.float32)
    params = init_params(k_p, C * H * W, HIDDEN, LATENT)

    fwd = jax.jit(vae_forward)
    z_mean, z_log_var, reconstruction = fwd(x, params, k_eps)
    jax.block_until_ready((z_mean, z_log_var, reconstruction))

    assert z_mean.shape == (B, LATENT)
    assert z_log_var.shape == (B, LATENT)
    assert reconstruction.shape == (B, C, H, W)
    print("KERNEL_OK")
</pallas_src>

<mosaic_0001>
module attributes {stable_mosaic.version = 11 : i64} {
  func.func @vae_fused_kernel(%arg0: i32, %arg1: memref<8x1024xbf16, #tpu.memory_space<vmem>>, %arg2: memref<8x8xf32, #tpu.memory_space<vmem>>, %arg3: memref<1024x32xbf16, #tpu.memory_space<vmem>>, %arg4: memref<1x32xf32, #tpu.memory_space<vmem>>, %arg5: memref<32x16xbf16, #tpu.memory_space<vmem>>, %arg6: memref<1x16xf32, #tpu.memory_space<vmem>>, %arg7: memref<8x32xbf16, #tpu.memory_space<vmem>>, %arg8: memref<1x32xf32, #tpu.memory_space<vmem>>, %arg9: memref<32x1024xbf16, #tpu.memory_space<vmem>>, %arg10: memref<1x1024xf32, #tpu.memory_space<vmem>>, %arg11: memref<8x8xf32, #tpu.memory_space<vmem>>, %arg12: memref<8x8xf32, #tpu.memory_space<vmem>>, %arg13: memref<8x1024xf32, #tpu.memory_space<vmem>>) attributes {dimension_semantics = [#tpu.dimension_semantics<parallel>], iteration_bounds = array<i64: 1>, scalar_prefetch = 0 : i64, scratch_operands = 0 : i64, tpu.core_type = #tpu.core_type<tc>, window_params = [{transform_indices = @transform_0, window_bounds = array<i64: 8, 1024>}, {transform_indices = @transform_1, window_bounds = array<i64: 8, 8>}, {pipeline_mode = #tpu.pipeline_mode<synchronous>, transform_indices = @transform_2, window_bounds = array<i64: 1024, 32>}, {pipeline_mode = #tpu.pipeline_mode<synchronous>, transform_indices = @transform_3, window_bounds = array<i64: 1, 32>}, {pipeline_mode = #tpu.pipeline_mode<synchronous>, transform_indices = @transform_4, window_bounds = array<i64: 32, 16>}, {pipeline_mode = #tpu.pipeline_mode<synchronous>, transform_indices = @transform_5, window_bounds = array<i64: 1, 16>}, {pipeline_mode = #tpu.pipeline_mode<synchronous>, transform_indices = @transform_6, window_bounds = array<i64: 8, 32>}, {pipeline_mode = #tpu.pipeline_mode<synchronous>, transform_indices = @transform_7, window_bounds = array<i64: 1, 32>}, {pipeline_mode = #tpu.pipeline_mode<synchronous>, transform_indices = @transform_8, window_bounds = array<i64: 32, 1024>}, {pipeline_mode = #tpu.pipeline_mode<synchronous>, transform_indices = @transform_9, window_bounds = array<i64: 1, 1024>}, {transform_indices = @transform_10, window_bounds = array<i64: 8, 8>}, {transform_indices = @transform_11, window_bounds = array<i64: 8, 8>}, {transform_indices = @transform_12, window_bounds = array<i64: 8, 1024>}]} {
    %c0 = arith.constant 0 : index
    %c0_0 = arith.constant 0 : index
    %0 = vector.load %arg1[%c0, %c0_0] : memref<8x1024xbf16, #tpu.memory_space<vmem>>, vector<8x1024xbf16>
    %c0_1 = arith.constant 0 : index
    %c0_2 = arith.constant 0 : index
    %1 = vector.load %arg3[%c0_1, %c0_2] : memref<1024x32xbf16, #tpu.memory_space<vmem>>, vector<1024x32xbf16>
    %cst = arith.constant dense<0.000000e+00> : vector<8x32xf32>
    %2 = tpu.matmul %0, %1, %cst {dimension_numbers = #tpu.dot_dimension_numbers<[1], [0], [0], [1], [0, 0, 1, 1], [], []>} : vector<8x1024xbf16>, vector<1024x32xbf16>, vector<8x32xf32> -> vector<8x32xf32>
    %c0_3 = arith.constant 0 : index
    %c0_4 = arith.constant 0 : index
    %3 = vector.load %arg4[%c0_3, %c0_4] : memref<1x32xf32, #tpu.memory_space<vmem>>, vector<1x32xf32>
    %4 = vector.broadcast %3 : vector<1x32xf32> to vector<8x32xf32>
    %5 = arith.addf %2, %4 : vector<8x32xf32>
    %cst_5 = arith.constant 0.000000e+00 : f32
    %6 = vector.broadcast %cst_5 : f32 to vector<8x32xf32>
    %7 = arith.maximumf %5, %6 : vector<8x32xf32>
    %8 = arith.truncf %7 : vector<8x32xf32> to vector<8x32xbf16>
    %c0_6 = arith.constant 0 : index
    %c0_7 = arith.constant 0 : index
    %9 = vector.load %arg5[%c0_6, %c0_7] : memref<32x16xbf16, #tpu.memory_space<vmem>>, vector<32x16xbf16>
    %cst_8 = arith.constant dense<0.000000e+00> : vector<8x16xf32>
    %10 = tpu.matmul %8, %9, %cst_8 {dimension_numbers = #tpu.dot_dimension_numbers<[1], [0], [0], [1], [0, 0, 1, 1], [], []>} : vector<8x32xbf16>, vector<32x16xbf16>, vector<8x16xf32> -> vector<8x16xf32>
    %c0_9 = arith.constant 0 : index
    %c0_10 = arith.constant 0 : index
    %11 = vector.load %arg6[%c0_9, %c0_10] : memref<1x16xf32, #tpu.memory_space<vmem>>, vector<1x16xf32>
    %12 = vector.broadcast %11 : vector<1x16xf32> to vector<8x16xf32>
    %13 = arith.addf %10, %12 : vector<8x16xf32>
    %14 = vector.extract_strided_slice %13 {offsets = [0, 0], sizes = [8, 8], strides = [1, 1]} : vector<8x16xf32> to vector<8x8xf32>
    %15 = vector.extract_strided_slice %13 {offsets = [0, 8], sizes = [8, 8], strides = [1, 1]} : vector<8x16xf32> to vector<8x8xf32>
    %c0_11 = arith.constant 0 : index
    %c0_12 = arith.constant 0 : index
    %16 = vector.load %arg11[%c0_11, %c0_12] : memref<8x8xf32, #tpu.memory_space<vmem>>, vector<8x8xf32>
    tpu.vector_store %arg11[%c0_11, %c0_12], %14 {strides = array<i32>} : memref<8x8xf32, #tpu.memory_space<vmem>>, vector<8x8xf32>,
    %c0_13 = arith.constant 0 : index
    %c0_14 = arith.constant 0 : index
    %17 = vector.load %arg12[%c0_13, %c0_14] : memref<8x8xf32, #tpu.memory_space<vmem>>, vector<8x8xf32>
    tpu.vector_store %arg12[%c0_13, %c0_14], %15 {strides = array<i32>} : memref<8x8xf32, #tpu.memory_space<vmem>>, vector<8x8xf32>,
    %c0_15 = arith.constant 0 : index
    %c0_16 = arith.constant 0 : index
    %18 = vector.load %arg2[%c0_15, %c0_16] : memref<8x8xf32, #tpu.memory_space<vmem>>, vector<8x8xf32>
    %cst_17 = arith.constant 5.000000e-01 : f32
    %19 = vector.broadcast %cst_17 : f32 to vector<8x8xf32>
    %20 = arith.mulf %19, %15 : vector<8x8xf32>
    %21 = math.exp %20 : vector<8x8xf32>
    %22 = arith.mulf %18, %21 : vector<8x8xf32>
    %23 = arith.addf %22, %14 : vector<8x8xf32>
    %24 = arith.truncf %23 : vector<8x8xf32> to vector<8x8xbf16>
    %c0_18 = arith.constant 0 : index
    %c0_19 = arith.constant 0 : index
    %25 = vector.load %arg7[%c0_18, %c0_19] : memref<8x32xbf16, #tpu.memory_space<vmem>>, vector<8x32xbf16>
    %cst_20 = arith.constant dense<0.000000e+00> : vector<8x32xf32>
    %26 = tpu.matmul %24, %25, %cst_20 {dimension_numbers = #tpu.dot_dimension_numbers<[1], [0], [0], [1], [0, 0, 1, 1], [], []>} : vector<8x8xbf16>, vector<8x32xbf16>, vector<8x32xf32> -> vector<8x32xf32>
    %c0_21 = arith.constant 0 : index
    %c0_22 = arith.constant 0 : index
    %27 = vector.load %arg8[%c0_21, %c0_22] : memref<1x32xf32, #tpu.memory_space<vmem>>, vector<1x32xf32>
    %28 = vector.broadcast %27 : vector<1x32xf32> to vector<8x32xf32>
    %29 = arith.addf %26, %28 : vector<8x32xf32>
    %cst_23 = arith.constant 0.000000e+00 : f32
    %30 = vector.broadcast %cst_23 : f32 to vector<8x32xf32>
    %31 = arith.maximumf %29, %30 : vector<8x32xf32>
    %32 = arith.truncf %31 : vector<8x32xf32> to vector<8x32xbf16>
    %c0_24 = arith.constant 0 : index
    %c0_25 = arith.constant 0 : index
    %33 = vector.load %arg9[%c0_24, %c0_25] : memref<32x1024xbf16, #tpu.memory_space<vmem>>, vector<32x1024xbf16>
    %cst_26 = arith.constant dense<0.000000e+00> : vector<8x1024xf32>
    %34 = tpu.matmul %32, %33, %cst_26 {dimension_numbers = #tpu.dot_dimension_numbers<[1], [0], [0], [1], [0, 0, 1, 1], [], []>} : vector<8x32xbf16>, vector<32x1024xbf16>, vector<8x1024xf32> -> vector<8x1024xf32>
    %c0_27 = arith.constant 0 : index
    %c0_28 = arith.constant 0 : index
    %35 = vector.load %arg10[%c0_27, %c0_28] : memref<1x1024xf32, #tpu.memory_space<vmem>>, vector<1x1024xf32>
    %36 = vector.broadcast %35 : vector<1x1024xf32> to vector<8x1024xf32>
    %37 = arith.addf %34, %36 : vector<8x1024xf32>
    %38 = arith.negf %37 : vector<8x1024xf32>
    %39 = math.exp %38 : vector<8x1024xf32>
    %cst_29 = arith.constant 1.000000e+00 : f32
    %40 = vector.broadcast %cst_29 : f32 to vector<8x1024xf32>
    %41 = arith.addf %40, %39 : vector<8x1024xf32>
    %42 = arith.divf %40, %41 : vector<8x1024xf32>
    %c0_30 = arith.constant 0 : index
    %c0_31 = arith.constant 0 : index
    %43 = vector.load %arg13[%c0_30, %c0_31] : memref<8x1024xf32, #tpu.memory_space<vmem>>, vector<8x1024xf32>
    tpu.vector_store %arg13[%c0_30, %c0_31], %42 {strides = array<i32>} : memref<8x1024xf32, #tpu.memory_space<vmem>>, vector<8x1024xf32>,
    return
  }
  func.func @transform_0(%arg0: i32) -> (i32, i32) {
    %c0_i32 = arith.constant 0 : i32
    %c0_i32_0 = arith.constant 0 : i32
    return %arg0, %c0_i32 : i32, i32
  }
  func.func @transform_1(%arg0: i32) -> (i32, i32) {
    %c0_i32 = arith.constant 0 : i32
    %c0_i32_0 = arith.constant 0 : i32
    return %arg0, %c0_i32 : i32, i32
  }
  func.func @transform_2(%arg0: i32) -> (i32, i32) {
    %c0_i32 = arith.constant 0 : i32
    %c0_i32_0 = arith.constant 0 : i32
    %c0_i32_1 = arith.constant 0 : i32
    return %c0_i32, %c0_i32_0 : i32, i32
  }
  func.func @transform_3(%arg0: i32) -> (i32, i32) {
    %c0_i32 = arith.constant 0 : i32
    %c0_i32_0 = arith.constant 0 : i32
    %c0_i32_1 = arith.constant 0 : i32
    return %c0_i32, %c0_i32_0 : i32, i32
  }
  func.func @transform_4(%arg0: i32) -> (i32, i32) {
    %c0_i32 = arith.constant 0 : i32
    %c0_i32_0 = arith.constant 0 : i32
    %c0_i32_1 = arith.constant 0 : i32
    return %c0_i32, %c0_i32_0 : i32, i32
  }
  func.func @transform_5(%arg0: i32) -> (i32, i32) {
    %c0_i32 = arith.constant 0 : i32
    %c0_i32_0 = arith.constant 0 : i32
    %c0_i32_1 = arith.constant 0 : i32
    return %c0_i32, %c0_i32_0 : i32, i32
  }
  func.func @transform_6(%arg0: i32) -> (i32, i32) {
    %c0_i32 = arith.constant 0 : i32
    %c0_i32_0 = arith.constant 0 : i32
    %c0_i32_1 = arith.constant 0 : i32
    return %c0_i32, %c0_i32_0 : i32, i32
  }
  func.func @transform_7(%arg0: i32) -> (i32, i32) {
    %c0_i32 = arith.constant 0 : i32
    %c0_i32_0 = arith.constant 0 : i32
    %c0_i32_1 = arith.constant 0 : i32
    return %c0_i32, %c0_i32_0 : i32, i32
  }
  func.func @transform_8(%arg0: i32) -> (i32, i32) {
    %c0_i32 = arith.constant 0 : i32
    %c0_i32_0 = arith.constant 0 : i32
    %c0_i32_1 = arith.constant 0 : i32
    return %c0_i32, %c0_i32_0 : i32, i32
  }
  func.func @transform_9(%arg0: i32) -> (i32, i32) {
    %c0_i32 = arith.constant 0 : i32
    %c0_i32_0 = arith.constant 0 : i32
    %c0_i32_1 = arith.constant 0 : i32
    return %c0_i32, %c0_i32_0 : i32, i32
  }
  func.func @transform_10(%arg0: i32) -> (i32, i32) {
    %c0_i32 = arith.constant 0 : i32
    %c0_i32_0 = arith.constant 0 : i32
    return %arg0, %c0_i32 : i32, i32
  }
  func.func @transform_11(%arg0: i32) -> (i32, i32) {
    %c0_i32 = arith.constant 0 : i32
    %c0_i32_0 = arith.constant 0 : i32
    return %arg0, %c0_i32 : i32, i32
  }
  func.func @transform_12(%arg0: i32) -> (i32, i32) {
    %c0_i32 = arith.constant 0 : i32
    %c0_i32_0 = arith.constant 0 : i32
    return %arg0, %c0_i32 : i32, i32
  }
}

</mosaic_0001>

<bundles_post_ra>
// kernel: vae_forward.1
= control target key start
LH: loop header
LB: loop body
LE: loop exit
PB: predicated region body
PF: predicated region fallthrough
CT: control target
= control target key end

     0   :  { %vm1594_vm0 = vmmov 0   ;;  %vm775_vm1 = vcmask 261120   ;;  %vm848_vm2 = vcmask 1043456   ;;  %vm819_vm3 = vcmask 64512   ;;  %s1976_s2 = inlined_call_operand.vmem [shape: bf16[1024,32], index: 2, kind: input, shape index: {}]   ;;  %s1977_s0 = inlined_call_operand.vmem [shape: bf16[8,1024], index: 0, kind: input, shape index: {}]   ;;  %s1978_s4 = inlined_call_operand.vmem [shape: bf16[32,16], index: 4, kind: input, shape index: {}]   ;;  %s1979_s3 = inlined_call_operand.vmem [shape: f32[1,32], index: 3, kind: input, shape index: {}]   ;;  %s1980_s6 = inlined_call_operand.vmem [shape: bf16[8,32], index: 6, kind: input, shape index: {}]   ;;  %s1981_s5 = inlined_call_operand.vmem [shape: f32[1,16], index: 5, kind: input, shape index: {}]   ;;  %s1982_s10 = inlined_call_operand.vmem [shape: f32[8,8], index: 10, kind: output, shape index: {0}]   ;;  %s1983_s8 = inlined_call_operand.vmem [shape: bf16[32,1024], index: 8, kind: input, shape index: {}]   ;;  %s1984_s1 = inlined_call_operand.vmem [shape: f32[8,8], index: 1, kind: input, shape index: {}]   ;;  %s1985_s11 = inlined_call_operand.vmem [shape: f32[8,8], index: 11, kind: output, shape index: {1}]   ;;  %s1986_s7 = inlined_call_operand.vmem [shape: f32[1,32], index: 7, kind: input, shape index: {}]   ;;  %s1987_s9 = inlined_call_operand.vmem [shape: f32[1,1024], index: 9, kind: input, shape index: {}]   ;;  %s1988_s12 = inlined_call_operand.vmem [shape: f32[8,1024], index: 12, kind: output, shape index: {2}]  }
   0x1   :  { %v1485_v0 = vld [vmem:[%s1976_s2 + $0x40] sm:$0xff]   ;;  %v1489_v4 = vld [vmem:[%s1976_s2 + $0x48] sm:$0xff]   ;;  %v1493_v8 = vld [vmem:[%s1976_s2 + $0x50] sm:$0xff]  }
   0x2   :  { %v1486_v1 = vld [vmem:[%s1976_s2 + $0xc0] sm:$0xff]   ;;  %1374 = vmatprep.subr.bf16.mxu0 %v1485_v0  ;;  %v1490_v5 = vld [vmem:[%s1976_s2 + $0xc8] sm:$0xff]   ;;  %v1494_v9 = vld [vmem:[%s1976_s2 + $0xd0] sm:$0xff]  }
   0x3   :  { %v1487_v2 = vld [vmem:[%s1976_s2] sm:$0xff]   ;;  %1396 = vmatprep.subr.bf16.mxu1 %v1486_v1  ;;  %v1491_v6 = vld [vmem:[%s1976_s2 + $0x8] sm:$0xff]   ;;  %v1495_v10 = vld [vmem:[%s1976_s2 + $0x10] sm:$0xff]  }
   0x4   :  { %v1488_v3 = vld [vmem:[%s1976_s2 + $0x80] sm:$0xff]   ;;  %1375 = vmatpush3.bf16.msra.mxu0 %v1487_v2  ;;  %v1492_v7 = vld [vmem:[%s1976_s2 + $0x88] sm:$0xff]   ;;  %v1496_v11 = vld [vmem:[%s1976_s2 + $0x90] sm:$0xff]  }
   0x5   :  { %1397 = vmatpush3.bf16.msra.mxu1 %v1488_v3  ;;  %1376 = vmatprep.subr.bf16.mxu0 %v1489_v4  ;;  %v1497_v12 = vld [vmem:[%s1976_s2 + $0x58] sm:$0xff]   ;;  %v1501_v16 = vld [vmem:[%s1976_s2 + $0x60] sm:$0xff]   ;;  %v1505_v20 = vld [vmem:[%s1976_s2 + $0x68] sm:$0xff]  }
   0x6   :  { %1398 = vmatprep.subr.bf16.mxu1 %v1490_v5  ;;  %v1498_v13 = vld [vmem:[%s1976_s2 + $0xd8] sm:$0xff]   ;;  %v1502_v17 = vld [vmem:[%s1976_s2 + $0xe0] sm:$0xff]   ;;  %v1506_v21 = vld [vmem:[%s1976_s2 + $0xe8] sm:$0xff]  }
   0x7   :  { %v1499_v14 = vld [vmem:[%s1976_s2 + $0x18] sm:$0xff]   ;;  %v1503_v18 = vld [vmem:[%s1976_s2 + $0x20] sm:$0xff]   ;;  %v1507_v22 = vld [vmem:[%s1976_s2 + $0x28] sm:$0xff]  }
   0x8   :  { %1377 = vmatpush3.bf16.msra.mxu0 %v1491_v6  ;;  %v1500_v15 = vld [vmem:[%s1976_s2 + $0x98] sm:$0xff]   ;;  %v1504_v19 = vld [vmem:[%s1976_s2 + $0xa0] sm:$0xff]   ;;  %v1508_v23 = vld [vmem:[%s1976_s2 + $0xa8] sm:$0xff]  }
   0x9   :  { %1399 = vmatpush3.bf16.msra.mxu1 %v1492_v7  ;;  %1378 = vmatprep.subr.bf16.mxu0 %v1493_v8  ;;  %v1509_v24 = vld [vmem:[%s1976_s2 + $0x70] sm:$0xff]   ;;  %v1513_v28 = vld [vmem:[%s1976_s2 + $0x78] sm:$0xff]   ;;  %v39_v32 = vld [vmem:[%s1977_s0] sm:$0xff] }
   0xa   :  { %1400 = vmatprep.subr.bf16.mxu1 %v1494_v9  ;;  %v1510_v25 = vld [vmem:[%s1976_s2 + $0xf0] sm:$0xff]   ;;  %v1514_v29 = vld [vmem:[%s1976_s2 + $0xf8] sm:$0xff]   ;;  %v40_v33 = vld [vmem:[%s1977_s0 + $0x8] sm:$0xff]  ;;  %v1268_v34 = vcombine.low %v39_v32, %v39_v32  ;;  %v1269_v35 = vcombine.high %v39_v32, %v39_v32 }
   0xb   :  { %v1511_v26 = vld [vmem:[%s1976_s2 + $0x30] sm:$0xff]   ;;  %v1515_v30 = vld [vmem:[%s1976_s2 + $0x38] sm:$0xff]   ;;  %v1270_v36 = vcombine.low %v40_v33, %v40_v33  ;;  %v1271_v37 = vcombine.high %v40_v33, %v40_v33  ;;  %v1521_v38 = vld [vmem:[%s1976_s2 + $0x140] sm:$0xff]  }
   0xc   :  { %1379 = vmatpush3.bf16.msra.mxu0 %v1495_v10  ;;  %v1512_v27 = vld [vmem:[%s1976_s2 + $0xb0] sm:$0xff]   ;;  %v1516_v31 = vld [vmem:[%s1976_s2 + $0xb8] sm:$0xff]   ;;  %v1522_v39 = vld [vmem:[%s1976_s2 + $0x1c0] sm:$0xff]   ;;  %622 = vmatprep.mubr.bf16.mxu0 %v1269_v35 }
   0xd   :  { %1401 = vmatpush3.bf16.msra.mxu1 %v1496_v11  ;;  %1380 = vmatprep.subr.bf16.mxu0 %v1497_v12  ;;  %v1523_v40 = vld [vmem:[%s1976_s2 + $0x100] sm:$0xff]   ;;  %v1525_v42 = vld [vmem:[%s1976_s2 + $0x148] sm:$0xff]   ;;  %v1529_v46 = vld [vmem:[%s1976_s2 + $0x150] sm:$0xff]  }
   0xe   :  { %1402 = vmatprep.subr.bf16.mxu1 %v1498_v13  ;;  %662 = vmatprep.mubr.bf16.mxu1 %v1271_v37  ;;  %v1524_v41 = vld [vmem:[%s1976_s2 + $0x180] sm:$0xff]   ;;  %v1526_v43 = vld [vmem:[%s1976_s2 + $0x1c8] sm:$0xff]   ;;  %v1530_v47 = vld [vmem:[%s1976_s2 + $0x1d0] sm:$0xff]   ;;  %v1593_v13 = vmov 0.0  }
   0xf   :  { %v1527_v44 = vld [vmem:[%s1976_s2 + $0x108] sm:$0xff]   ;;  %v1531_v48 = vld [vmem:[%s1976_s2 + $0x110] sm:$0xff]   ;;  %v1533_v50 = vld [vmem:[%s1976_s2 + $0x158] sm:$0xff]  }
  0x10   :  { %1381 = vmatpush3.bf16.msra.mxu0 %v1499_v14  ;;  %v1528_v45 = vld [vmem:[%s1976_s2 + $0x188] sm:$0xff]   ;;  %v1532_v49 = vld [vmem:[%s1976_s2 + $0x190] sm:$0xff]   ;;  %v1534_v51 = vld [vmem:[%s1976_s2 + $0x1d8] sm:$0xff]  }
  0x11   :  { %1403 = vmatpush3.bf16.msra.mxu1 %v1500_v15  ;;  %1382 = vmatprep.subr.bf16.mxu0 %v1501_v16  ;;  %v1535_v52 = vld [vmem:[%s1976_s2 + $0x118] sm:$0xff]   ;;  %v1537_v54 = vld [vmem:[%s1976_s2 + $0x160] sm:$0xff]   ;;  %v1541_v58 = vld [vmem:[%s1976_s2 + $0x168] sm:$0xff]  }
  0x12   :  { %1404 = vmatprep.subr.bf16.mxu1 %v1502_v17  ;;  %v1536_v53 = vld [vmem:[%s1976_s2 + $0x198] sm:$0xff]   ;;  %v1538_v55 = vld [vmem:[%s1976_s2 + $0x1e0] sm:$0xff]   ;;  %v1542_v59 = vld [vmem:[%s1976_s2 + $0x1e8] sm:$0xff]  }
  0x13   :  { %v1539_v56 = vld [vmem:[%s1976_s2 + $0x120] sm:$0xff]   ;;  %v1543_v60 = vld [vmem:[%s1976_s2 + $0x128] sm:$0xff]   ;;  %v1545_v62 = vld [vmem:[%s1976_s2 + $0x170] sm:$0xff]  }
  0x14   :  { %1383 = vmatpush3.bf16.msra.mxu0 %v1503_v18  ;;  %v1540_v57 = vld [vmem:[%s1976_s2 + $0x1a0] sm:$0xff]   ;;  %v1544_v61 = vld [vmem:[%s1976_s2 + $0x1a8] sm:$0xff]   ;;  %v1546_v63 = vld [vmem:[%s1976_s2 + $0x1f0] sm:$0xff]  }
  0x15   :  { %1405 = vmatpush3.bf16.msra.mxu1 %v1504_v19  ;;  %1384 = vmatprep.subr.bf16.mxu0 %v1505_v20  ;;  %v1547_v0 = vld [vmem:[%s1976_s2 + $0x130] sm:$0xff]   ;;  %v1549_v2 = vld [vmem:[%s1976_s2 + $0x178] sm:$0xff]   ;;  %v1557_v12 = vld [vmem:[%s1978_s4] sm:$0xff]  }
  0x16   :  { %1406 = vmatprep.subr.bf16.mxu1 %v1506_v21  ;;  %v1548_v1 = vld [vmem:[%s1976_s2 + $0x1b0] sm:$0xff]   ;;  %v1550_v3 = vld [vmem:[%s1976_s2 + $0x1f8] sm:$0xff]   ;;  %v1558_v14 = vld [vmem:[%s1978_s4 + $0x8] sm:$0xff]  }
  0x17   :  { %v1551_v4 = vld [vmem:[%s1976_s2 + $0x138] sm:$0xff]   ;;  %v41_v6 = vld [vmem:[%s1977_s0 + $0x10] sm:$0xff]  ;;  %v1267_v17 = vld [vmem:[%s1979_s3] ss:$0 sm:$0xff] }
  0x18   :  { %1385 = vmatpush3.bf16.msra.mxu0 %v1507_v22  ;;  %v1552_v5 = vld [vmem:[%s1976_s2 + $0x1b8] sm:$0xff]   ;;  %v1272_v7 = vcombine.low %v41_v6, %v41_v6  ;;  %v1273_v8 = vcombine.high %v41_v6, %v41_v6 }
  0x19   :  { %1407 = vmatpush3.bf16.msra.mxu1 %v1508_v23  ;;  %1386 = vmatprep.subr.bf16.mxu0 %v1509_v24  ;;  %v42_v9 = vld [vmem:[%s1977_s0 + $0x18] sm:$0xff] }
  0x1a   :  { %1408 = vmatprep.subr.bf16.mxu1 %v1510_v25  ;;  %v1274_v10 = vcombine.low %v42_v9, %v42_v9  ;;  %v1275_v11 = vcombine.high %v42_v9, %v42_v9 }
  0x1c   :  { %1387 = vmatpush3.bf16.msra.mxu0 %v1511_v26 }
  0x1d   :  { %1409 = vmatpush3.bf16.msra.mxu1 %v1512_v27  ;;  %1388 = vmatprep.subr.bf16.mxu0 %v1513_v28 }
  0x1e   :  { %1410 = vmatprep.subr.bf16.mxu1 %v1514_v29 }
  0x20   :  { %1389 = vmatpush3.bf16.msra.mxu0 %v1515_v30 }
  0x21   :  { %1411 = vmatpush3.bf16.msra.mxu1 %v1516_v31  ;;  %1418 = vmatprep.subr.bf16.mxu0 %v1521_v38 }
  0x22   :  { %1440 = vmatprep.subr.bf16.mxu1 %v1522_v39 }
  0x23   :  { %623 = vmatmul.mubr.bf16.vlgmr.msra.gmra.mrb[0].mxu0 %v1268_v34 }
  0x24   :  { %663 = vmatmul.mubr.bf16.vlgmr.msra.gmra.mrb[0].mxu1 %v1270_v36  ;;  %1419 = vmatpush3.bf16.msra.mxu0 %v1523_v40 }
  0x25   :  { %1441 = vmatpush3.bf16.msra.mxu1 %v1524_v41  ;;  %1420 = vmatprep.subr.bf16.mxu0 %v1525_v42  ;;  %v837_v42 = vld [vmem:[%s1980_s6] sm:$0xf] }
  0x26   :  { %1442 = vmatprep.subr.bf16.mxu1 %v1526_v43  ;;  %702 = vmatprep.mubr.bf16.mxu0 %v1273_v8  ;;  %v850_v43 = vsel %vm848_vm2, %v837_v42, 0 }
  0x27   :  { %742 = vmatprep.mubr.bf16.mxu1 %v1275_v11  ;;  %v896_v11 = vld [vmem:[%s1983_s8 + $0x10] sm:$0xff] }
  0x28   :  { %1421 = vmatpush3.bf16.msra.mxu0 %v1527_v44  ;;  %v1340_v44 = vld [vmem:[%s1981_s5] ss:$0 sm:$0xff] }
  0x29   :  { %1443 = vmatpush3.bf16.msra.mxu1 %v1528_v45  ;;  %1422 = vmatprep.subr.bf16.mxu0 %v1529_v46 }
  0x2a   :  { %1444 = vmatprep.subr.bf16.mxu1 %v1530_v47 }
  0x2c   :  { %1423 = vmatpush3.bf16.msra.mxu0 %v1531_v48 }
  0x2d   :  { %1445 = vmatpush3.bf16.msra.mxu1 %v1532_v49  ;;  %1424 = vmatprep.subr.bf16.mxu0 %v1533_v50 }
  0x2e   :  { %1446 = vmatprep.subr.bf16.mxu1 %v1534_v51 }
  0x30   :  { %1425 = vmatpush3.bf16.msra.mxu0 %v1535_v52  ;;  %v894_v52 = vld [vmem:[%s1983_s8] sm:$0xff] }
  0x31   :  { %1447 = vmatpush3.bf16.msra.mxu1 %v1536_v53  ;;  %1426 = vmatprep.subr.bf16.mxu0 %v1537_v54  ;;  %v898_v53 = vld [vmem:[%s1983_s8 + $0x20] sm:$0xff]  ;;  %v895_v54 = vld [vmem:[%s1983_s8 + $0x8] sm:$0xff] }
  0x32   :  { %1448 = vmatprep.subr.bf16.mxu1 %v1538_v55  ;;  %v1346_v55 = vcombine.low %v894_v52, %v898_v53 }
  0x34   :  { %1427 = vmatpush3.bf16.msra.mxu0 %v1539_v56  ;;  %v1347_v56 = vcombine.high %v894_v52, %v898_v53 }
  0x35   :  { %1449 = vmatpush3.bf16.msra.mxu1 %v1540_v57  ;;  %1428 = vmatprep.subr.bf16.mxu0 %v1541_v58  ;;  %v899_v57 = vld [vmem:[%s1983_s8 + $0x28] sm:$0xff] }
  0x36   :  { %1450 = vmatprep.subr.bf16.mxu1 %v1542_v59  ;;  %v1348_v58 = vcombine.low %v895_v54, %v899_v57  ;;  %v1349_v59 = vcombine.high %v895_v54, %v899_v57 }
  0x38   :  { %1429 = vmatpush3.bf16.msra.mxu0 %v1543_v60 }
  0x39   :  { %1451 = vmatpush3.bf16.msra.mxu1 %v1544_v61  ;;  %1430 = vmatprep.subr.bf16.mxu0 %v1545_v62  ;;  %v826_v61 = vld [vmem:[%s1984_s1] sm:$0xff] }
  0x3a   :  { %1452 = vmatprep.subr.bf16.mxu1 %v1546_v63 }
  0x3c   :  { %1431 = vmatpush3.bf16.msra.mxu0 %v1547_v0 }
  0x3d   :  { %1453 = vmatpush3.bf16.msra.mxu1 %v1548_v1  ;;  %1432 = vmatprep.subr.bf16.mxu0 %v1549_v2 }
  0x3e   :  { %1454 = vmatprep.subr.bf16.mxu1 %v1550_v3  ;;  %v902_v3 = vld [vmem:[%s1983_s8 + $0x40] sm:$0xff] }
  0x40   :  { %1433 = vmatpush3.bf16.msra.mxu0 %v1551_v4  ;;  %v906_v4 = vld [vmem:[%s1983_s8 + $0x60] sm:$0xff] }
  0x41   :  { %1455 = vmatpush3.bf16.msra.mxu1 %v1552_v5  ;;  %1467 = vmatprep.subr.bf16.mxu0 %v1593_v13  ;;  %v903_v5 = vld [vmem:[%s1983_s8 + $0x48] sm:$0xff]  ;;  %v1355_v6 = vcombine.high %v902_v3, %v906_v4  ;;  %v1354_v8 = vcombine.low %v902_v3, %v906_v4 }
  0x42   :  { %1475 = vmatprep.subr.bf16.mxu1 %v1593_v13 }
  0x43   :  { %703 = vmatmul.mubr.bf16.vlgmr.msra.gmra.mrb[4].mxu0 %v1272_v7  ;;  %v907_v7 = vld [vmem:[%s1983_s8 + $0x68] sm:$0xff] }
  0x44   :  { %743 = vmatmul.mubr.bf16.vlgmr.msra.gmra.mrb[4].mxu1 %v1274_v10  ;;  %1468 = vmatpush3.bf16.msra.mxu0 %v1557_v12  ;;  %v1356_v9 = vcombine.low %v903_v5, %v907_v7  ;;  %v1357_v10 = vcombine.high %v903_v5, %v907_v7  ;;  %v900_v12 = vld [vmem:[%s1983_s8 + $0x30] sm:$0xff] }
  0x45   :  { %1469 = vmatprep.subr.bf16.mxu0 %v1593_v13  ;;  %1471 = vmatprep.mubr.msk.bf16.mxu0 %vm1594_vm0, %v1593_v13 }
  0x46   :  { %1477 = vmatprep.mubr.msk.bf16.mxu1 %vm1594_vm0, %v1593_v13  ;;  %1476 = vmatpush3.bf16.msra.mxu1 %v850_v43  ;;  %v897_v13 = vld [vmem:[%s1983_s8 + $0x18] sm:$0xff] }
  0x47   :  { %1076 = vmatprep.subr.bf16.mxu1 %v1349_v59 }
  0x48   :  { %1470 = vmatpush3.bf16.msra.mxu0 %v1558_v14  ;;  %v1350_v14 = vcombine.low %v896_v11, %v900_v12 }
  0x49   :  { %1035 = vmatprep.subr.bf16.mxu0 %v1347_v56 }
  0xf6   :  { %v1390_v15 = vpop.f32.mrb[0].mxu0 }
  0xf7   :  { %v1412_v16 = vpop.f32.mrb[0].mxu1  ;;  %v1391_v18 = vpop.f32.mrb[1].mxu0 }
  0xf8   :  { %v1413_v19 = vpop.f32.mrb[1].mxu1  ;;  %v1392_v20 = vadd.f32 %v1391_v18, %v1390_v15  ;;  %v1393_v22 = vpop.f32.mrb[2].mxu0  ;;  %v1351_v15 = vcombine.high %v896_v11, %v900_v12 }
  0xf9   :  { %v1414_v21 = vadd.f32 %v1413_v19, %v1412_v16  ;;  %v1415_v23 = vpop.f32.mrb[2].mxu1  ;;  %v1394_v24 = vpop.f32.mrb[3].mxu0  ;;  %v901_v16 = vld [vmem:[%s1983_s8 + $0x38] sm:$0xff] }
  0xfa   :  { %v1416_v25 = vpop.f32.mrb[3].mxu1  ;;  %v625_v26 = vadd.f32 %v1392_v20, %v1267_v17  ;;  %v1596_v17 = vmov 0   ;;  %v1352_v18 = vcombine.low %v897_v13, %v901_v16  ;;  %v1353_v19 = vcombine.high %v897_v13, %v901_v16  ;;  %v1344_v20 = vld [vmem:[%s1986_s7] ss:$0 sm:$0xff]  ;;  %v904_v24 = vld [vmem:[%s1983_s8 + $0x50] sm:$0xff] }
  0xfc   :  { %v665_v27 = vadd.f32 %v1414_v21, %v625_v26  ;;  %v908_v26 = vld [vmem:[%s1983_s8 + $0x70] sm:$0xff] }
 0x116   :  { %v1434_v28 = vpop.f32.mrb[4].mxu0 }
 0x117   :  { %v1456_v29 = vpop.f32.mrb[4].mxu1  ;;  %v1435_v30 = vpop.f32.mrb[5].mxu0 }
 0x118   :  { %v1457_v31 = vpop.f32.mrb[5].mxu1  ;;  %v1436_v32 = vadd.f32 %v1435_v30, %v1434_v28  ;;  %v1437_v34 = vpop.f32.mrb[6].mxu0  ;;  %v909_v28 = vld [vmem:[%s1983_s8 + $0x78] sm:$0xff] }
 0x119   :  { %v1458_v33 = vadd.f32 %v1457_v31, %v1456_v29  ;;  %v1459_v35 = vpop.f32.mrb[6].mxu1  ;;  %v1438_v36 = vpop.f32.mrb[7].mxu0  ;;  %v1358_v34 = vcombine.low %v904_v24, %v908_v26 }
 0x11a   :  { %v1460_v37 = vpop.f32.mrb[7].mxu1  ;;  %v705_v38 = vadd.f32 %v1436_v32, %v665_v27  ;;  %v905_v27 = vld [vmem:[%s1983_s8 + $0x58] sm:$0xff]  ;;  %v1359_v32 = vcombine.high %v904_v24, %v908_v26  ;;  %v912_v36 = vlaneseq }
 0x11b   :  { %v1360_v35 = vcombine.low %v905_v27, %v909_v28 }
 0x11c   :  { %v745_v39 = vadd.f32 %v1458_v33, %v705_v38  ;;  %v1361_v33 = vcombine.high %v905_v27, %v909_v28  ;;  %v913_v37 = vshrl.u32 %v912_v36, 7 }
 0x11e   :  { %v750_v40 = vmax.f32 %v745_v39, 0.0  ;;  %v914_v38 = vsub.s32 0, %v913_v37  ;;  %v922_v39 = vsub.s32 2, %v913_v37  ;;  %v926_v42 = vsub.s32 3, %v913_v37 }
 0x11f   :  { %v930_v53 = vsub.s32 4, %v913_v37  ;;  %v938_v54 = vsub.s32 6, %v913_v37  ;;  %v934_v59 = vsub.s32 5, %v913_v37 }
 0x120   :  { %v751_v41 = vpack.c.bf16 %v750_v40, %v750_v40  ;;  %v910_v40 = vld [vmem:[%s1987_s9] sm:$0xff] }
 0x121   :  { %v915_v43 = vrot.slane %v910_v40, %v914_v38  ;;  %v931_v3 = vrot.slane %v910_v40, %v930_v53  ;;  %v939_v4 = vrot.slane %v910_v40, %v938_v54  ;;  %v935_v5 = vrot.slane %v910_v40, %v934_v59 }
 0x122   :  { %1472 = vmatmul.mubr.msk.bf16.vlgmr.msra.gmra.mrb[8].mxu0 %vm775_vm1, %v751_v41  ;;  %v918_v41 = vsub.s32 1, %v913_v37 }
 0x123   :  { %1036 = vmatpush1.bf16.msra.mxu0 %v1346_v55  ;;  %1067 = vmatprep.mubr.bf16.mxu0 %v1596_v17 }
 0x124   :  { %1037 = vmatprep.subr.bf16.mxu0 %v1355_v6 }
 0x127   :  { %1038 = vmatpush1.bf16.msra.mxu0 %v1354_v8 }
 0x128   :  { %1117 = vmatprep.subr.bf16.mxu0 %v1351_v15 }
 0x1f5   :  { %v813_v45 = vpop.f32.mrb[8].mxu0 }
 0x1f6   :  { %v814_v46 = vadd.f32 %v1340_v44, %v813_v45  ;;  %v1473_v47 = vpop.f32.mrb[9].mxu0  ;;  %v923_v44 = vrot.slane %v910_v40, %v922_v39  ;;  %v919_v45 = vrot.slane %v910_v40, %v918_v41 }
 0x1f7   :  { %v816_v48 = vpop.f32.mrb[10].mxu0 }
 0x1f8   :  { %v827_v49 = vmul.f32 0.5, %v814_v46  ;;  %v1474_v50 = vpop.f32.mrb[11].mxu0  ;;  %820 = vst.msk [vmem:[%s1982_s10] sm:$0xff] %vm819_vm3, %v814_v46  ;;  %s1595_s10 = smov 120  }
 0x1fa   :  { %v828_v51 = vmul.f32 1.442695, %v827_v49 }
 0x1fc   :  { %1559 = vpow2.f32 %v828_v51 }
 0x206   :  { %v1560_v60 = vpop.eup %1559 }
 0x207   :  { %831 = vrot.lane.b32.xlu0 %v1560_v60, %s1595_s10  ;;  %v942_v60 = vsub.s32 7, %v913_v37 }
 0x209   :  { %v943_v6 = vrot.slane %v910_v40, %v942_v60 }
 0x20b   :  { %822 = vrot.lane.b32.xlu0 %v814_v46, %s1595_s10 }
 0x279   :  { %v832_v62 = vpop.permute.xlu0 %831 }
 0x27a   :  { %v834_v63 = vmul.f32 %v832_v62, %v826_v61 }
 0x27c   :  { %v835_v0 = vadd.f32 %v834_v63, %v814_v46  ;;  %v927_v46 = vrot.slane %v910_v40, %v926_v42 }
 0x27d   :  { %v823_v1 = vpop.permute.xlu0 %822 }
 0x27e   :  { %v836_v2 = vpack.c.bf16 %v835_v0, %v835_v0  ;;  %825 = vst.msk [vmem:[%s1985_s11] sm:$0xff] %vm819_vm3, %v823_v1 }
 0x280   :  { %1478 = vmatmul.mubr.msk.bf16.vlgmr.msra.gmra.mrb[8].mxu1 %vm819_vm3, %v836_v2 }
 0x281   :  { %1077 = vmatpush1.bf16.msra.mxu1 %v1348_v58  ;;  %1108 = vmatprep.mubr.bf16.mxu1 %v1596_v17 }
 0x282   :  { %1078 = vmatprep.subr.bf16.mxu1 %v1357_v10 }
 0x285   :  { %1079 = vmatpush1.bf16.msra.mxu1 %v1356_v9 }
 0x286   :  { %1158 = vmatprep.subr.bf16.mxu1 %v1353_v19 }
 0x353   :  { %v886_v21 = vpop.f32.mrb[8].mxu1 }
 0x354   :  { %v887_v22 = vadd.f32 %v1344_v20, %v886_v21  ;;  %v1479_v23 = vpop.f32.mrb[9].mxu1 }
 0x355   :  { %v889_v25 = vpop.f32.mrb[10].mxu1 }
 0x356   :  { %v892_v29 = vmax.f32 %v887_v22, 0.0  ;;  %v1480_v30 = vpop.f32.mrb[11].mxu1 }
 0x358   :  { %v893_v31 = vpack.c.bf16 %v892_v29, %v892_v29 }
 0x35a   :  { %1362 = vmatmul.mubr.msk.bf16.vlgmr.msra.gmra.mrb[12].mxu0 %vm775_vm1, %v893_v31  ;;  %1363 = vmatmul.mubr.msk.bf16.vlgmr.msra.gmra.mrb[12].mxu1 %vm775_vm1, %v893_v31 }
 0x35b   :  { %1118 = vmatpush1.bf16.msra.mxu0 %v1350_v14  ;;  %1159 = vmatpush1.bf16.msra.mxu1 %v1352_v18 }
 0x35c   :  { %1119 = vmatprep.subr.bf16.mxu0 %v1359_v32  ;;  %1160 = vmatprep.subr.bf16.mxu1 %v1361_v33 }
 0x35d   :  { %1149 = vmatprep.mubr.bf16.mxu0 %v1596_v17  ;;  %1190 = vmatprep.mubr.bf16.mxu1 %v1596_v17 }
 0x35f   :  { %1120 = vmatpush1.bf16.msra.mxu0 %v1358_v34  ;;  %1161 = vmatpush1.bf16.msra.mxu1 %v1360_v35 }
 0x362   :  { %1364 = vmatmul.mubr.msk.bf16.vlgmr.msra.gmra.mrb[16].mxu0 %vm775_vm1, %v893_v31  ;;  %1365 = vmatmul.mubr.msk.bf16.vlgmr.msra.gmra.mrb[16].mxu1 %vm775_vm1, %v893_v31 }
 0x42d   :  { %v1069_v47 = vpop.f32.mrb[12].mxu0  ;;  %v1110_v48 = vpop.f32.mrb[12].mxu1 }
 0x42e   :  { %v1070_v49 = vadd.f32 %v1069_v47, %v915_v43  ;;  %v1111_v50 = vadd.f32 %v1110_v48, %v923_v44  ;;  %v1071_v51 = vpop.f32.mrb[13].mxu0  ;;  %v1112_v52 = vpop.f32.mrb[13].mxu1 }
 0x42f   :  { %v1072_v55 = vadd.f32 %v1071_v51, %v919_v45  ;;  %v1113_v56 = vadd.f32 %v1112_v52, %v927_v46  ;;  %v1073_v57 = vpop.f32.mrb[14].mxu0  ;;  %v1114_v58 = vpop.f32.mrb[14].mxu1 }
 0x430   :  { %v1366_v61 = vmul.f32 -1.442695, %v1070_v49  ;;  %v1368_v62 = vmul.f32 -1.442695, %v1111_v50  ;;  %v1074_v63 = vpop.f32.mrb[15].mxu0  ;;  %v1115_v0 = vpop.f32.mrb[15].mxu1 }
 0x431   :  { %v1367_v1 = vmul.f32 -1.442695, %v1072_v55  ;;  %v1369_v2 = vmul.f32 -1.442695, %v1113_v56 }
 0x432   :  { %1561 = vpow2.f32 %v1366_v61 }
 0x433   :  { %1563 = vpow2.f32 %v1368_v62 }
 0x434   :  { %1565 = vpow2.f32 %v1367_v1 }
 0x435   :  { %1567 = vpow2.f32 %v1369_v2  ;;  %v1151_v7 = vpop.f32.mrb[16].mxu0  ;;  %v1192_v8 = vpop.f32.mrb[16].mxu1 }
 0x436   :  { %v1152_v9 = vadd.f32 %v1151_v7, %v931_v3  ;;  %v1193_v10 = vadd.f32 %v1192_v8, %v939_v4  ;;  %v1153_v11 = vpop.f32.mrb[17].mxu0  ;;  %v1194_v12 = vpop.f32.mrb[17].mxu1 }
 0x437   :  { %v1154_v13 = vadd.f32 %v1153_v11, %v935_v5  ;;  %v1195_v14 = vadd.f32 %v1194_v12, %v943_v6  ;;  %v1155_v15 = vpop.f32.mrb[18].mxu0  ;;  %v1196_v16 = vpop.f32.mrb[18].mxu1 }
 0x438   :  { %v1370_v17 = vmul.f32 -1.442695, %v1152_v9  ;;  %v1372_v18 = vmul.f32 -1.442695, %v1193_v10  ;;  %v1156_v19 = vpop.f32.mrb[19].mxu0  ;;  %v1197_v20 = vpop.f32.mrb[19].mxu1 }
 0x439   :  { %v1371_v21 = vmul.f32 -1.442695, %v1154_v13  ;;  %v1373_v22 = vmul.f32 -1.442695, %v1195_v14 }
 0x43a   :  { %1569 = vpow2.f32 %v1370_v17 }
 0x43b   :  { %1571 = vpow2.f32 %v1372_v18 }
 0x43c   :  { %v1562_v23 = vpop.eup %1561  ;;  %1573 = vpow2.f32 %v1371_v21 }
 0x43d   :  { %v1564_v24 = vpop.eup %1563  ;;  %v1223_v25 = vadd.f32 1.0, %v1562_v23  ;;  %1575 = vpow2.f32 %v1373_v22 }
 0x43e   :  { %v1566_v26 = vpop.eup %1565  ;;  %v1225_v27 = vadd.f32 1.0, %v1564_v24 }
 0x43f   :  { %v1568_v28 = vpop.eup %1567  ;;  %1577 = vrcp.f32 %v1223_v25  ;;  %v1224_v29 = vadd.f32 1.0, %v1566_v26 }
 0x440   :  { %1579 = vrcp.f32 %v1225_v27  ;;  %v1226_v30 = vadd.f32 1.0, %v1568_v28 }
 0x441   :  { %1581 = vrcp.f32 %v1224_v29 }
 0x442   :  { %1583 = vrcp.f32 %v1226_v30 }
 0x444   :  { %v1570_v31 = vpop.eup %1569 }
 0x445   :  { %v1572_v32 = vpop.eup %1571  ;;  %v1227_v33 = vadd.f32 1.0, %v1570_v31 }
 0x446   :  { %v1574_v34 = vpop.eup %1573  ;;  %v1229_v35 = vadd.f32 1.0, %v1572_v32 }
 0x447   :  { %v1576_v36 = vpop.eup %1575  ;;  %1585 = vrcp.f32 %v1227_v33  ;;  %v1228_v37 = vadd.f32 1.0, %v1574_v34 }
 0x448   :  { %1587 = vrcp.f32 %v1229_v35  ;;  %v1230_v38 = vadd.f32 1.0, %v1576_v36 }
 0x449   :  { %v1578_v39 = vpop.eup %1577  ;;  %1589 = vrcp.f32 %v1228_v37 }
 0x44a   :  { %v1580_v40 = vpop.eup %1579  ;;  %1247 = vst [vmem:[%s1988_s12] sm:$0xff] %v1578_v39  ;;  %1591 = vrcp.f32 %v1230_v38 }
 0x44b   :  { %v1582_v41 = vpop.eup %1581  ;;  %1249 = vst [vmem:[%s1988_s12 + $0x10] sm:$0xff] %v1580_v40 }
 0x44c   :  { %v1584_v42 = vpop.eup %1583  ;;  %1248 = vst [vmem:[%s1988_s12 + $0x8] sm:$0xff] %v1582_v41 }
 0x44d   :  { %1250 = vst [vmem:[%s1988_s12 + $0x18] sm:$0xff] %v1584_v42 }
 0x451   :  { %v1586_v43 = vpop.eup %1585 }
 0x452   :  { %v1588_v44 = vpop.eup %1587  ;;  %1251 = vst [vmem:[%s1988_s12 + $0x20] sm:$0xff] %v1586_v43 }
 0x453   :  { %v1590_v45 = vpop.eup %1589  ;;  %1253 = vst [vmem:[%s1988_s12 + $0x30] sm:$0xff] %v1588_v44 }
 0x454   :  { %v1592_v46 = vpop.eup %1591  ;;  %1252 = vst [vmem:[%s1988_s12 + $0x28] sm:$0xff] %v1590_v45 }
 0x455   :  { %1254 = vst [vmem:[%s1988_s12 + $0x38] sm:$0xff] %v1592_v46 }

</bundles_post_ra>
